<compile_context>
chip_gen: v7x
topology: tpu7x:2x2x1
jax: 0.10.0
libtpu: 0.0.40
codegen_flags: <defaults>
</compile_context>

<pallas_src>
import math

import numpy as np
import jax
import jax.numpy as jnp
from jax.experimental import pallas as pl
from jax.experimental.pallas import tpu as pltpu


def _round_up(x, m):
    return ((x + m - 1) // m) * m


# -----------------------------------------------------------------------------
# Fused kernel:
#   im2col (largest window) -> one conv matmul (all branches stacked on N)
#   -> bias + ReLU -> per-window time mask -> max-pool over time
#   -> dropout multiply -> final linear matmul + bias.
# -----------------------------------------------------------------------------
def _make_fused_kernel(bt, tp, wmax, emb, n_out, n_cls):
    def kernel(x_ref, w_ref, cb_ref, tmask_ref, drop_ref, lw_ref, lb_ref,
               o_ref):
        # x_ref:     (BT, L_pad, E)      bf16
        # w_ref:     (wmax*E, n_win*F)   bf16  (zero rows for k >= w_i)
        # cb_ref:    (1, n_win*F)        f32   (stacked conv biases)
        # tmask_ref: (1, Tp, n_win*F)    f32   (1 for valid t < T_i, else 0)
        # drop_ref:  (BT, n_win*F)       f32   ({0, 1/keep_prob})
        # lw_ref:    (n_win*F, C)        bf16
        # lb_ref:    (1, C)              f32
        # o_ref:     (BT, C)             f32
        x = x_ref[...]

        # Single im2col slab for the LARGEST window; smaller windows are
        # handled by zero-padded weight rows, so one matmul serves all
        # branches.
        cols = [x[:, k:k + tp, :] for k in range(wmax)]
        xu = jnp.concatenate(cols, axis=-1)              # (BT, Tp, wmax*E)
        xu = xu.reshape(bt * tp, wmax * emb)

        s = jnp.dot(xu, w_ref[...],
                    preferred_element_type=jnp.float32)  # (BT*Tp, n_win*F)
        s = jnp.maximum(s + cb_ref[...], 0.0)            # bias + ReLU (f32)

        # Zero out invalid / padded time positions (safe: post-ReLU >= 0).
        s = s.reshape(bt, tp, n_out) * tmask_ref[...]
        pooled = jnp.max(s, axis=1)                      # (BT, n_win*F)

        # Inverted dropout (mask precomputed on host) + final linear.
        xd = (pooled * drop_ref[...]).astype(jnp.bfloat16)
        o_ref[...] = jnp.dot(xd, lw_ref[...],
                             preferred_element_type=jnp.float32) + lb_ref[...]

    return kernel


# -----------------------------------------------------------------------------
# Full TextcnnLayer forward
# -----------------------------------------------------------------------------
def textcnn_forward(x_nchw, conv_ws_torch, conv_bs, lin_w, lin_b,
                    window_sizes, dropout_rate, dropout_key):
    """x_nchw: (B, 1, L, E) like the PyTorch conv input.
       conv_ws_torch[i]: (F, 1, w_i, E); conv_bs[i]: (F,)
       lin_w: (C, D), lin_b: (C,).  Returns (B, C) float32 logits."""
    B, _, L, E = x_nchw.shape
    F = int(conv_bs[0].shape[0])
    C = int(lin_b.shape[0])
    n_win = len(window_sizes)
    D = n_win * F
    wmax = max(window_sizes)
    keep_prob = 1.0 - float(dropout_rate)
    assert 0.0 < keep_prob <= 1.0, "dropout_rate must be in [0, 1)"

    t_list = [L - w + 1 for w in window_sizes]
    assert min(t_list) >= 1, "sequence shorter than largest window"
    Tp = _round_up(max(t_list), 8)                 # common padded time length
    L_pad = _round_up(max(L, Tp + wmax - 1), 8)

    # (B, 1, L, E) -> (B, L_pad, E), zero-padded time axis, bf16 for the MXU.
    x = x_nchw[:, 0, :, :]
    x = jnp.pad(x, ((0, 0), (0, L_pad - L), (0, 0))).astype(jnp.bfloat16)

    # Combined conv weight: (wmax*E, n_win*F).  For window i, its (w_i*E, F)
    # block sits in rows [0, w_i*E) of columns [i*F, (i+1)*F); rest is zero.
    w_blocks = []
    for wt, wsz in zip(conv_ws_torch, window_sizes):
        blk = jnp.transpose(wt[:, 0, :, :].reshape(F, wsz * E))   # (w*E, F)
        blk = jnp.pad(blk, ((0, (wmax - wsz) * E), (0, 0)))       # (wmax*E, F)
        w_blocks.append(blk)
    W = jnp.concatenate(w_blocks, axis=1).astype(jnp.bfloat16)    # (wmax*E, D)

    cb = jnp.concatenate(conv_bs).reshape(1, D).astype(jnp.float32)

    # Per-window time-validity mask (precomputed, tiny).
    tm = np.zeros((1, Tp, D), np.float32)
    for i, T in enumerate(t_list):
        tm[0, :T, i * F:(i + 1) * F] = 1.0
    tmask = jnp.asarray(tm)

    # Inverted-dropout mask, generated on host (always applied, like
    # F.dropout with default training=True).
    # TODO(synk): bit-for-bit match with torch's dropout RNG is not possible.
    if keep_prob < 1.0:
        keep = jax.random.bernoulli(dropout_key, p=keep_prob, shape=(B, D))
        drop = keep.astype(jnp.float32) * jnp.float32(1.0 / keep_prob)
    else:
        drop = jnp.ones((B, D), jnp.float32)

    lw_t = lin_w.T.astype(jnp.bfloat16)            # (D, C)
    lb2 = lin_b.reshape(1, C).astype(jnp.float32)

    # Large batch tile to amortize per-grid-step overhead.
    BT = min(B, 256)
    num_bt = pl.cdiv(B, BT)

    # Per-step VMEM estimate (double-buffered inputs + intermediates).
    est = (2 * BT * L_pad * E * 2            # x tile, bf16
           + BT * Tp * wmax * E * 2          # im2col slab, bf16
           + 2 * BT * Tp * D * 4             # conv / ReLU f32 intermediates
           + 2 * (wmax * E * D + D * C) * 2  # weights, bf16
           + 2 * (BT * D + Tp * D + BT * C) * 4)
    vmem_limit = int(min(max(2 * est, 32 << 20), 48 << 20))

    kernel = _make_fused_kernel(BT, Tp, wmax, E, D, C)

    grid_spec = pltpu.PrefetchScalarGridSpec(
        num_scalar_prefetch=0,
        grid=(num_bt,),
        in_specs=[
            pl.BlockSpec((BT, L_pad, E), lambda i: (i, 0, 0)),
            pl.BlockSpec((wmax * E, D), lambda i: (0, 0)),
            pl.BlockSpec((1, D), lambda i: (0, 0)),
            pl.BlockSpec((1, Tp, D), lambda i: (0, 0, 0)),
            pl.BlockSpec((BT, D), lambda i: (i, 0)),
            pl.BlockSpec((D, C), lambda i: (0, 0)),
            pl.BlockSpec((1, C), lambda i: (0, 0)),
        ],
        out_specs=pl.BlockSpec((BT, C), lambda i: (i, 0)),
    )

    return pl.pallas_call(
        kernel,
        out_shape=jax.ShapeDtypeStruct((B, C), jnp.float32),
        grid_spec=grid_spec,
        compiler_params=pltpu.CompilerParams(
            dimension_semantics=("parallel",),
            vmem_limit_bytes=vmem_limit),
    )(x, W, cb, tmask, drop, lw_t, lb2)


if __name__ == "__main__":
    # Small, module-consistent shapes.
    B, L = 2, 16
    embedding_dim = 32
    window_sizes = (3, 4, 5)
    feature_map_size = 16
    dropout_rate = 0.5
    class_size = 8

    key = jax.random.PRNGKey(0)
    n_keys = 2 + 2 * len(window_sizes) + 2
    keys = jax.random.split(key, n_keys)

    # Input in PyTorch NCHW convention: (B, 1, L, E).
    x_nchw = jax.random.normal(keys[0], (B, 1, L, embedding_dim),
                               dtype=jnp.float32)

    # Deterministic parameter init mimicking nn.Conv2d / nn.Linear defaults
    # (uniform(-1/sqrt(fan_in), 1/sqrt(fan_in))).
    conv_ws, conv_bs = [], []
    for idx, wsz in enumerate(window_sizes):
        fan_in = 1 * wsz * embedding_dim
        bound = 1.0 / math.sqrt(fan_in)
        w_torch = jax.random.uniform(keys[1 + 2 * idx],
                                     (feature_map_size, 1, wsz, embedding_dim),
                                     minval=-bound, maxval=bound,
                                     dtype=jnp.float32)
        b_torch = jax.random.uniform(keys[2 + 2 * idx], (feature_map_size,),
                                     minval=-bound, maxval=bound,
                                     dtype=jnp.float32)
        conv_ws.append(w_torch)
        conv_bs.append(b_torch)

    D = feature_map_size * len(window_sizes)
    bound = 1.0 / math.sqrt(D)
    lin_w = jax.random.uniform(keys[-3], (class_size, D),
                               minval=-bound, maxval=bound, dtype=jnp.float32)
    lin_b = jax.random.uniform(keys[-2], (class_size,),
                               minval=-bound, maxval=bound, dtype=jnp.float32)
    dropout_key = keys[-1]

    logits = textcnn_forward(x_nchw, conv_ws, conv_bs, lin_w, lin_b,
                             window_sizes, dropout_rate, dropout_key)
    jax.block_until_ready(logits)
    assert logits.shape == (B, class_size), logits.shape
    assert logits.dtype == jnp.float32
    assert bool(jnp.all(jnp.isfinite(logits)))
    print("KERNEL_OK")
</pallas_src>

<mosaic_0001>
module attributes {stable_mosaic.version = 11 : i64} {
  func.func @kernel(%arg0: i32, %arg1: memref<2x24x32xbf16, #tpu.memory_space<vmem>>, %arg2: memref<160x48xbf16, #tpu.memory_space<vmem>>, %arg3: memref<1x48xf32, #tpu.memory_space<vmem>>, %arg4: memref<1x16x48xf32, #tpu.memory_space<vmem>>, %arg5: memref<2x48xf32, #tpu.memory_space<vmem>>, %arg6: memref<48x8xbf16, #tpu.memory_space<vmem>>, %arg7: memref<1x8xf32, #tpu.memory_space<vmem>>, %arg8: memref<2x8xf32, #tpu.memory_space<vmem>>) attributes {dimension_semantics = [#tpu.dimension_semantics<parallel>], iteration_bounds = array<i64: 1>, scalar_prefetch = 0 : i64, scratch_operands = 0 : i64, tpu.core_type = #tpu.core_type<tc>, window_params = [{transform_indices = @transform_0, window_bounds = array<i64: 2, 24, 32>}, {pipeline_mode = #tpu.pipeline_mode<synchronous>, transform_indices = @transform_1, window_bounds = array<i64: 160, 48>}, {pipeline_mode = #tpu.pipeline_mode<synchronous>, transform_indices = @transform_2, window_bounds = array<i64: 1, 48>}, {pipeline_mode = #tpu.pipeline_mode<synchronous>, transform_indices = @transform_3, window_bounds = array<i64: 1, 16, 48>}, {transform_indices = @transform_4, window_bounds = array<i64: 2, 48>}, {pipeline_mode = #tpu.pipeline_mode<synchronous>, transform_indices = @transform_5, window_bounds = array<i64: 48, 8>}, {pipeline_mode = #tpu.pipeline_mode<synchronous>, transform_indices = @transform_6, window_bounds = array<i64: 1, 8>}, {transform_indices = @transform_7, window_bounds = array<i64: 2, 8>}]} {
    %c0 = arith.constant 0 : index
    %c0_0 = arith.constant 0 : index
    %c0_1 = arith.constant 0 : index
    %0 = vector.load %arg1[%c0, %c0_0, %c0_1] : memref<2x24x32xbf16, #tpu.memory_space<vmem>>, vector<2x24x32xbf16>
    %1 = vector.extract_strided_slice %0 {offsets = [0, 0, 0], sizes = [2, 16, 32], strides = [1, 1, 1]} : vector<2x24x32xbf16> to vector<2x16x32xbf16>
    %2 = vector.extract_strided_slice %0 {offsets = [0, 1, 0], sizes = [2, 16, 32], strides = [1, 1, 1]} : vector<2x24x32xbf16> to vector<2x16x32xbf16>
    %3 = vector.extract_strided_slice %0 {offsets = [0, 2, 0], sizes = [2, 16, 32], strides = [1, 1, 1]} : vector<2x24x32xbf16> to vector<2x16x32xbf16>
    %4 = vector.extract_strided_slice %0 {offsets = [0, 3, 0], sizes = [2, 16, 32], strides = [1, 1, 1]} : vector<2x24x32xbf16> to vector<2x16x32xbf16>
    %5 = vector.extract_strided_slice %0 {offsets = [0, 4, 0], sizes = [2, 16, 32], strides = [1, 1, 1]} : vector<2x24x32xbf16> to vector<2x16x32xbf16>
    %6 = tpu.concatenate %1, %2, %3, %4, %5 in 2 : vector<2x16x32xbf16>, vector<2x16x32xbf16>, vector<2x16x32xbf16>, vector<2x16x32xbf16>, vector<2x16x32xbf16> -> vector<2x16x160xbf16>
    %7 = vector.shape_cast %6 : vector<2x16x160xbf16> to vector<32x160xbf16>
    %c0_2 = arith.constant 0 : index
    %c0_3 = arith.constant 0 : index
    %8 = vector.load %arg2[%c0_2, %c0_3] : memref<160x48xbf16, #tpu.memory_space<vmem>>, vector<160x48xbf16>
    %cst = arith.constant dense<0.000000e+00> : vector<32x48xf32>
    %9 = tpu.matmul %7, %8, %cst {dimension_numbers = #tpu.dot_dimension_numbers<[1], [0], [0], [1], [0, 0, 1, 1], [], []>} : vector<32x160xbf16>, vector<160x48xbf16>, vector<32x48xf32> -> vector<32x48xf32>
    %c0_4 = arith.constant 0 : index
    %c0_5 = arith.constant 0 : index
    %10 = vector.load %arg3[%c0_4, %c0_5] : memref<1x48xf32, #tpu.memory_space<vmem>>, vector<1x48xf32>
    %11 = vector.broadcast %10 : vector<1x48xf32> to vector<32x48xf32>
    %12 = arith.addf %9, %11 : vector<32x48xf32>
    %cst_6 = arith.constant 0.000000e+00 : f32
    %13 = vector.broadcast %cst_6 : f32 to vector<32x48xf32>
    %14 = arith.maximumf %12, %13 : vector<32x48xf32>
    %15 = vector.shape_cast %14 : vector<32x48xf32> to vector<2x16x48xf32>
    %c0_7 = arith.constant 0 : index
    %c0_8 = arith.constant 0 : index
    %c0_9 = arith.constant 0 : index
    %16 = vector.load %arg4[%c0_7, %c0_8, %c0_9] : memref<1x16x48xf32, #tpu.memory_space<vmem>>, vector<1x16x48xf32>
    %17 = vector.broadcast %16 : vector<1x16x48xf32> to vector<2x16x48xf32>
    %18 = arith.mulf %15, %17 : vector<2x16x48xf32>
    %cst_10 = arith.constant dense<0xFF800000> : vector<2x48xf32>
    %19 = vector.multi_reduction <maximumf>, %18, %cst_10 [1] : vector<2x16x48xf32> to vector<2x48xf32>
    %c0_11 = arith.constant 0 : index
    %c0_12 = arith.constant 0 : index
    %20 = vector.load %arg5[%c0_11, %c0_12] : memref<2x48xf32, #tpu.memory_space<vmem>>, vector<2x48xf32>
    %21 = arith.mulf %19, %20 : vector<2x48xf32>
    %22 = arith.truncf %21 : vector<2x48xf32> to vector<2x48xbf16>
    %c0_13 = arith.constant 0 : index
    %c0_14 = arith.constant 0 : index
    %23 = vector.load %arg6[%c0_13, %c0_14] : memref<48x8xbf16, #tpu.memory_space<vmem>>, vector<48x8xbf16>
    %cst_15 = arith.constant dense<0.000000e+00> : vector<2x8xf32>
    %24 = tpu.matmul %22, %23, %cst_15 {dimension_numbers = #tpu.dot_dimension_numbers<[1], [0], [0], [1], [0, 0, 1, 1], [], []>} : vector<2x48xbf16>, vector<48x8xbf16>, vector<2x8xf32> -> vector<2x8xf32>
    %c0_16 = arith.constant 0 : index
    %c0_17 = arith.constant 0 : index
    %25 = vector.load %arg7[%c0_16, %c0_17] : memref<1x8xf32, #tpu.memory_space<vmem>>, vector<1x8xf32>
    %26 = vector.broadcast %25 : vector<1x8xf32> to vector<2x8xf32>
    %27 = arith.addf %24, %26 : vector<2x8xf32>
    %c0_18 = arith.constant 0 : index
    %c0_19 = arith.constant 0 : index
    %28 = vector.load %arg8[%c0_18, %c0_19] : memref<2x8xf32, #tpu.memory_space<vmem>>, vector<2x8xf32>
    tpu.vector_store %arg8[%c0_18, %c0_19], %27 {strides = array<i32>} : memref<2x8xf32, #tpu.memory_space<vmem>>, vector<2x8xf32>,
    return
  }
  func.func @transform_0(%arg0: i32) -> (i32, i32, i32) {
    %c0_i32 = arith.constant 0 : i32
    %c0_i32_0 = arith.constant 0 : i32
    %c0_i32_1 = arith.constant 0 : i32
    return %arg0, %c0_i32, %c0_i32_0 : i32, i32, i32
  }
  func.func @transform_1(%arg0: i32) -> (i32, i32) {
    %c0_i32 = arith.constant 0 : i32
    %c0_i32_0 = arith.constant 0 : i32
    %c0_i32_1 = arith.constant 0 : i32
    return %c0_i32, %c0_i32_0 : i32, i32
  }
  func.func @transform_2(%arg0: i32) -> (i32, i32) {
    %c0_i32 = arith.constant 0 : i32
    %c0_i32_0 = arith.constant 0 : i32
    %c0_i32_1 = arith.constant 0 : i32
    return %c0_i32, %c0_i32_0 : i32, i32
  }
  func.func @transform_3(%arg0: i32) -> (i32, i32, i32) {
    %c0_i32 = arith.constant 0 : i32
    %c0_i32_0 = arith.constant 0 : i32
    %c0_i32_1 = arith.constant 0 : i32
    %c0_i32_2 = arith.constant 0 : i32
    return %c0_i32, %c0_i32_0, %c0_i32_1 : i32, i32, i32
  }
  func.func @transform_4(%arg0: i32) -> (i32, i32) {
    %c0_i32 = arith.constant 0 : i32
    %c0_i32_0 = arith.constant 0 : i32
    return %arg0, %c0_i32 : i32, i32
  }
  func.func @transform_5(%arg0: i32) -> (i32, i32) {
    %c0_i32 = arith.constant 0 : i32
    %c0_i32_0 = arith.constant 0 : i32
    %c0_i32_1 = arith.constant 0 : i32
    return %c0_i32, %c0_i32_0 : i32, i32
  }
  func.func @transform_6(%arg0: i32) -> (i32, i32) {
    %c0_i32 = arith.constant 0 : i32
    %c0_i32_0 = arith.constant 0 : i32
    %c0_i32_1 = arith.constant 0 : i32
    return %c0_i32, %c0_i32_0 : i32, i32
  }
  func.func @transform_7(%arg0: i32) -> (i32, i32) {
    %c0_i32 = arith.constant 0 : i32
    %c0_i32_0 = arith.constant 0 : i32
    return %arg0, %c0_i32 : i32, i32
  }
}

</mosaic_0001>

<bundles_post_ra>
// kernel: tpu_custom_call.1
= control target key start
LH: loop header
LB: loop body
LE: loop exit
PB: predicated region body
PF: predicated region fallthrough
CT: control target
= control target key end

     0   :  { %vm50_vm0 = vsmask.f32 7424  ;;  %vm90_vm1 = vsmask.f32 6400  ;;  %vm79_vm2 = vcmask 1046528   ;;  %s499_s10 = smov 32   ;;  %s659_s0 = inlined_call_operand.vmem [shape: bf16[2,24,32], index: 0, kind: input, shape index: {}]   ;;  %s660_s1 = inlined_call_operand.vmem [shape: bf16[160,48], index: 1, kind: input, shape index: {}]   ;;  %s661_s2 = inlined_call_operand.vmem [shape: f32[1,48], index: 2, kind: input, shape index: {}]   ;;  %s662_s3 = inlined_call_operand.vmem [shape: f32[1,16,48], index: 3, kind: input, shape index: {}]   ;;  %s663_s4 = inlined_call_operand.vmem [shape: f32[2,48], index: 4, kind: input, shape index: {}]   ;;  %s664_s5 = inlined_call_operand.vmem [shape: bf16[48,8], index: 5, kind: input, shape index: {}]   ;;  %s665_s6 = inlined_call_operand.vmem [shape: f32[1,8], index: 6, kind: input, shape index: {}]   ;;  %s666_s7 = inlined_call_operand.hbm [shape: f32[2,8], index: 7, kind: output, shape index: {}]  }
   0x1   :  { %v549_v0 = vld [vmem:[%s659_s0] sm:$0xff]   ;;  %v554_v1 = vld [vmem:[%s659_s0 + $0x8] ss:$0 sps:$4 sm:$0xff]   ;;  %v559_v2 = vld [vmem:[%s659_s0 + $0xc] sm:$0xff]   ;;  %s500_s11 = smov 96   ;;  %v501_v37 = vmov 0  }
   0x2   :  { %v52_v3 = vshrl.u32 %v549_v0, 16  ;;  %v54_v4 = vshll.u32 %v549_v0, 16  ;;  %v59_v5 = vshll.u32 %v554_v1, 16  ;;  %v94_v6 = vshrl.u32 %v554_v1, 16  ;;  %v461_v12 = vld [vmem:[%s659_s0 + $0x14] ss:$0 sps:$4 sm:$0xff]   ;;  %230 = vmatprep.subr.bf16.mxu0 %v501_v37 }
   0x3   :  { %v80_v7 = vrot.slane %v549_v0, 1  ;;  %v81_v15 = vrot.slane %v554_v1, 1  ;;  %v64_v16 = vshrl.u32 %v559_v2, 16  ;;  %v66_v19 = vshll.u32 %v559_v2, 16  ;;  %v462_v28 = vld [vmem:[%s660_s1] sm:$0xff]   ;;  %v463_v39 = vld [vmem:[%s660_s1 + $0x8] sm:$0xff]  }
   0x4   :  { %v56_v8 = vrot.slane %v54_v4, 1  ;;  %v61_v9 = vrot.slane %v59_v5, 1  ;;  %v91_v10 = vrot.slane %v52_v3, 1  ;;  %v92_v11 = vrot.slane %v54_v4, 2  ;;  %231 = vmatpush1.bf16.msra.mxu0 %v462_v28  ;;  %s502_s14 = smov 64   ;;  %v464_v44 = vld [vmem:[%s660_s1 + $0x10] sm:$0xff]  }
   0x5   :  { %v96_v13 = vrot.slane %v94_v6, 1  ;;  %v97_v14 = vrot.slane %v59_v5, 2  ;;  %v71_v20 = vshll.u32 %v461_v12, 16  ;;  %v83_v22 = vrot.slane %v559_v2, 1  ;;  %232 = vmatprep.subr.bf16.mxu0 %v501_v37 }
   0x6   :  { %v57_v17 = vor.u32 %v56_v8, %v52_v3  ;;  %v93_v18 = vor.u32 %v92_v11, %v91_v10  ;;  %v100_v23 = vrot.slane %v64_v16, 1  ;;  %v68_v25 = vrot.slane %v66_v19, 1 }
   0x7   :  { %v98_v21 = vor.u32 %v97_v14, %v96_v13  ;;  %v73_v26 = vrot.slane %v71_v20, 1  ;;  %v101_v27 = vrot.slane %v66_v19, 2  ;;  %v103_v30 = vshrl.u32 %v461_v12, 16 }
   0x8   :  { %v62_v24 = vsel %vm50_vm0, %v57_v17, %v61_v9  ;;  %v106_v31 = vrot.slane %v71_v20, 2  ;;  %v82_v32 = vsel %vm79_vm2, %v80_v7, %v81_v15  ;;  %v69_v33 = vor.u32 %v68_v25, %v64_v16  ;;  %233 = vmatpush1.bf16.msra.mxu0 %v463_v39 }
   0x9   :  { %75 = vrot.lane.b32.xlu0 %v62_v24, %s499_s10  ;;  %v99_v29 = vsel %vm90_vm1, %v93_v18, %v98_v21  ;;  %v84_v34 = vrot.slane %v461_v12, 1  ;;  %v102_v35 = vor.u32 %v101_v27, %v100_v23  ;;  %v105_v36 = vrot.slane %v103_v30, 1  ;;  %234 = vmatprep.subr.bf16.mxu0 %v501_v37 }
   0xa   :  { %109 = vrot.lane.b32.xlu1 %v99_v29, %s500_s11  ;;  %v74_v38 = vsel %vm50_vm0, %v69_v33, %v73_v26  ;;  %vm113_vm3 = vcmask 1045504   ;;  %v114_v43 = vrot.slane %v549_v0, 2  ;;  %v115_v45 = vrot.slane %v554_v1, 2 }
   0xb   :  { %v107_v40 = vor.u32 %v106_v31, %v105_v36  ;;  %v85_v41 = vsel %vm79_vm2, %v83_v22, %v84_v34  ;;  %v117_v46 = vrot.slane %v559_v2, 2  ;;  %vm120_vm4 = vcmask 261120  }
   0xc   :  { %v118_v47 = vrot.slane %v461_v12, 2  ;;  %v116_v48 = vsel %vm113_vm3, %v114_v43, %v115_v45 }
   0xd   :  { %86 = vrot.lane.b32.xlu0 %v82_v32, %s502_s14  ;;  %v108_v42 = vsel %vm90_vm1, %v102_v35, %v107_v40  ;;  %430 = vmatprep.mubr.msk.bf16.mxu0 %vm120_vm4, %v116_v48 }
   0xe   :  { %77 = vrot.lane.b32.xlu1 %v74_v38, %s499_s10  ;;  %v119_v49 = vsel %vm113_vm3, %v117_v46, %v118_v47 }
  0x11   :  { %88 = vrot.lane.b32.xlu0 %v85_v41, %s502_s14 }
  0x12   :  { %111 = vrot.lane.b32.xlu1 %v108_v42, %s500_s11 }
  0x13   :  { %12 = vsyncpa [#allocation3], 0  ;;  %235 = vmatpush1.bf16.msra.mxu0 %v464_v44  ;;  %v465_v50 = vld [vmem:[%s660_s1 + $0x18] sm:$0xff]   ;;  %v466_v51 = vld [vmem:[%s660_s1 + $0x20] sm:$0xff]   ;;  %vm125_vm5 = vcmask 523264   ;;  %vm130_vm6 = vcmask 785408  }
  0x14   :  { %236 = vmatprep.subr.bf16.mxu0 %v501_v37  ;;  %v467_v52 = vld [vmem:[%s660_s1 + $0x28] sm:$0xff]   ;;  %v468_v53 = vld [vmem:[%s660_s1 + $0x30] sm:$0xff]   ;;  %v469_v54 = vld [vmem:[%s660_s1 + $0x38] sm:$0xff]   ;;  %vm504_vm7 = vmmov 0   ;;  %vm289_vm8 = vcmask 392192   ;;  %vm335_vm9 = vcmask 1041409  }
  0x15   :  { %v470_v55 = vld [vmem:[%s660_s1 + $0x40] sm:$0xff]   ;;  %v471_v56 = vld [vmem:[%s660_s1 + $0x48] sm:$0xff]   ;;  %v474_v8 = vld [vmem:[%s664_s5 + $0x10] sm:$0xff]   ;;  %vm399_vm10 = vcmask 58368  }
  0x16   :  { %v472_v7 = vld [vmem:[%s664_s5] sm:$0xff]   ;;  %v284_v18 = vld [vmem:[%s662_s3 + $0x8] sm:$0xff] }
  0x17   :  { %237 = vmatpush1.bf16.msra.mxu0 %v465_v50  ;;  %v419_v9 = vld [vmem:[%s661_s2] ss:$0 sm:$0xff] }
  0x18   :  { %238 = vmatprep.subr.bf16.mxu0 %v501_v37  ;;  %v283_v13 = vld [vmem:[%s662_s3] sm:$0xff] }
  0x19   :  { %v308_v48 = vld [vmem:[%s663_s4] sm:$0x3]  ;;  %s505_s4 = smov [#allocation2]  }
  0x1a   :  { %v310_v50 = vrot.slane %v308_v48, 1  ;;  %s407_s19 = sshll.u32 %s505_s4, 4  ;;  %s408_s19 = int_to_ptr.vmem [resolvable:$true] %s407_s19 }
  0x1b   :  { %239 = vmatpush1.bf16.msra.mxu0 %v466_v51  ;;  %s475_s20 = scalar_lea.vmem %s408_s19, 32  ;;  %p480_p1 = scmp.lt.s32.totalorder %s408_s19, %s408_s19 }
  0x1c   :  { %240 = vmatprep.subr.bf16.mxu0 %v501_v37  ;;  %p476_p0 = scmp.ne.s32.totalorder %s408_s19, %s475_s20  ;;  %p481_p2 = scmp.lt.s32.totalorder %s475_s20, %s475_s20 }
  0x1e   :  { %p482_p3 = por %p481_p2, %p480_p1 }
  0x1f   :  { %241 = vmatpush1.bf16.msra.mxu0 %v467_v52 }
  0x20   :  { %242 = vmatprep.subr.bf16.mxu0 %v501_v37  ;;  %p483_p4 = pnand %p482_p3, %p476_p0 }
  0x23   :  { %243 = vmatpush1.bf16.msra.mxu0 %v468_v53 }
  0x24   :  { %244 = vmatprep.subr.bf16.mxu0 %v501_v37 }
  0x27   :  { %245 = vmatpush1.bf16.msra.mxu0 %v469_v54 }
  0x28   :  { %246 = vmatprep.subr.bf16.mxu0 %v501_v37 }
  0x2b   :  { %247 = vmatpush1.bf16.msra.mxu0 %v470_v55 }
  0x2c   :  { %248 = vmatprep.subr.bf16.mxu0 %v501_v37 }
  0x2f   :  { %249 = vmatpush1.bf16.msra.mxu0 %v471_v56 }
  0x7b   :  { %v76_v57 = vpop.permute.xlu0 %75 }
  0x7c   :  { %v110_v58 = vpop.permute.xlu1 %109  ;;  %v122_v59 = vsel %vm120_vm4, %v549_v0, %v76_v57  ;;  %v503_v0 = vmov 0.0  }
  0x7d   :  { %441 = vmatprep.subr.bf16.mxu1 %v503_v0  ;;  %447 = vmatprep.mubr.msk.bf16.mxu1 %vm504_vm7, %v503_v0 }
  0x7e   :  { %442 = vmatpush3.bf16.msra.mxu1 %v472_v7 }
  0x7f   :  { %v87_v60 = vpop.permute.xlu0 %86  ;;  %443 = vmatprep.subr.bf16.mxu1 %v503_v0 }
  0x80   :  { %v127_v61 = vsel %vm125_vm5, %v122_v59, %v87_v60  ;;  %v78_v62 = vpop.permute.xlu1 %77 }
  0x81   :  { %v132_v63 = vsel %vm130_vm6, %v127_v61, %v110_v58  ;;  %v124_v1 = vsel %vm120_vm4, %v559_v2, %v78_v62  ;;  %v473_v2 = vld [vmem:[%s664_s5 + $0x8] sm:$0xff]   ;;  %v432_v61 = vld [vmem:[%s665_s6] ss:$0 sm:$0xff] }
  0x82   :  { %263 = vmatmul.mubr.bf16.vlgmr.msra.gmra.mrb[0].mxu0 %v132_v63  ;;  %444 = vmatpush3.bf16.msra.mxu1 %v473_v2 }
  0x83   :  { %v89_v3 = vpop.permute.xlu0 %88  ;;  %431 = vmatprep.mubr.msk.bf16.mxu0 %vm120_vm4, %v119_v49  ;;  %445 = vmatprep.subr.bf16.mxu1 %v503_v0 }
  0x84   :  { %v129_v4 = vsel %vm125_vm5, %v124_v1, %v89_v3  ;;  %v112_v5 = vpop.permute.xlu1 %111 }
  0x85   :  { %v135_v6 = vsel %vm130_vm6, %v129_v4, %v112_v5 }
  0x86   :  { %446 = vmatpush3.bf16.msra.mxu1 %v474_v8 }
  0x8a   :  { %271 = vmatmul.mubr.bf16.gmra.mrb[4].mxu0 %v135_v6 }
 0x155   :  { %v264_v10 = vpop.f32.mrb[0].mxu0 }
 0x156   :  { %v265_v11 = vadd.f32 %v419_v9, %v264_v10  ;;  %v266_v12 = vpop.f32.mrb[1].mxu0 }
 0x157   :  { %v267_v14 = vpop.f32.mrb[2].mxu0 }
 0x158   :  { %v279_v15 = vmax.f32 %v265_v11, 0.0  ;;  %v268_v16 = vadd.f32 %v419_v9, %v267_v14  ;;  %v269_v17 = vpop.f32.mrb[3].mxu0 }
 0x15a   :  { %v285_v19 = vmul.f32 %v283_v13, %v279_v15  ;;  %v280_v20 = vmax.f32 %v268_v16, 0.0 }
 0x15c   :  { %v286_v21 = vmul.f32 %v284_v18, %v280_v20  ;;  %v290_v23 = vsel %vm289_vm8, %v285_v19, -inf }
 0x15d   :  { %v272_v22 = vpop.f32.mrb[4].mxu0 }
 0x15e   :  { %v291_v24 = vsel %vm289_vm8, %v286_v21, -inf  ;;  %v273_v25 = vadd.f32 %v419_v9, %v272_v22  ;;  %v274_v26 = vpop.f32.mrb[5].mxu0 }
 0x15f   :  { %v292_v27 = vmax.f32 %v290_v23, %v291_v24  ;;  %v275_v28 = vpop.f32.mrb[6].mxu0 }
 0x160   :  { %v281_v29 = vmax.f32 %v273_v25, 0.0  ;;  %v276_v30 = vadd.f32 %v419_v9, %v275_v28  ;;  %v277_v31 = vpop.f32.mrb[7].mxu0 }
 0x161   :  { %v293_v32 = vrot.slane %v292_v27, 4 }
 0x162   :  { %v287_v33 = vmul.f32 %v283_v13, %v281_v29  ;;  %v282_v34 = vmax.f32 %v276_v30, 0.0 }
 0x163   :  { %v294_v35 = vmax.f32 %v292_v27, %v293_v32 }
 0x164   :  { %v288_v36 = vmul.f32 %v284_v18, %v282_v34  ;;  %v299_v38 = vsel %vm289_vm8, %v287_v33, -inf }
 0x165   :  { %v295_v37 = vrot.slane %v294_v35, 2 }
 0x166   :  { %v300_v39 = vsel %vm289_vm8, %v288_v36, -inf }
 0x167   :  { %v296_v40 = vmax.f32 %v294_v35, %v295_v37  ;;  %v301_v41 = vmax.f32 %v299_v38, %v300_v39 }
 0x169   :  { %v302_v42 = vrot.slane %v301_v41, 4  ;;  %v297_v43 = vrot.slane %v296_v40, 1 }
 0x16b   :  { %v303_v44 = vmax.f32 %v301_v41, %v302_v42  ;;  %v298_v46 = vmax.f32 %v296_v40, %v297_v43 }
 0x16d   :  { %v304_v45 = vrot.slane %v303_v44, 2  ;;  %v313_v52 = vmul.f32 %v308_v48, %v298_v46 }
 0x16f   :  { %v305_v47 = vmax.f32 %v303_v44, %v304_v45  ;;  %v315_v54 = vpack.c.bf16 %v313_v52, %v313_v52 }
 0x171   :  { %v306_v49 = vrot.slane %v305_v47, 1  ;;  %v332_v57 = vunpack.c.l.b16 %v315_v54 }
 0x173   :  { %v307_v51 = vmax.f32 %v305_v47, %v306_v49 }
 0x175   :  { %v314_v53 = vmul.f32 %v310_v50, %v307_v51 }
 0x177   :  { %v316_v55 = vpack.c.bf16 %v314_v53, %v314_v53 }
 0x179   :  { %v333_v56 = vunpack.c.l.b16 %v316_v55 }
 0x17b   :  { %v334_v58 = vrot.slane %v333_v56, 7 }
 0x17d   :  { %v336_v59 = vsel %vm335_vm9, %v334_v58, %v332_v57 }
 0x17e   :  { %v337_v60 = vpack.c.b16 %v336_v59, %v336_v59 }
 0x180   :  { %448 = vmatmul.mubr.msk.bf16.vlgmr.msra.gmra.mrb[0].mxu1 %vm289_vm8, %v337_v60 }
 0x253   :  { %v393_v62 = vpop.f32.mrb[0].mxu1 }
 0x254   :  { %v394_v63 = vadd.f32 %v432_v61, %v393_v62  ;;  %v449_v1 = vpop.f32.mrb[1].mxu1 }
 0x255   :  { %v396_v3 = vpop.f32.mrb[2].mxu1 }
 0x256   :  { %v450_v4 = vpop.f32.mrb[3].mxu1  ;;  %400 = vst.msk [vmem:[#allocation2] sm:$0x3] %vm399_vm10, %v394_v63 }
 0x257   :  { %486 = shalt.err (!%p483_p4)
}
 0x258   :  { %s487_s6 = scalar_lea.hbm %s666_s7, 32 }
 0x259   :  { %p488_p5 = scmp.ne.s32.totalorder %s666_s7, %s487_s6  ;;  %p491_p6 = scmp.lt.u32.totalorder %s487_s6, %s666_s7 }
 0x25b   :  { %p493_p7 = pnand %p491_p6, %p488_p5 }
 0x25d   :  { %496 = shalt.err (!%p493_p7)
}
 0x25e   :  { %410 = dma.vmem_to_hbm [thread:$0]  %s408_s19, 32, %s666_s7, [#allocation3]  }
 0x25f   :  { %497 = dma.done.wait [#allocation3], 32  }
 0x260   :  { %498 = vsyncadd [#allocation3], 4294967264 }
 0x261   :  { %414 = vsyncpa [#allocation3], 1 }

</bundles_post_ra>
